<compile_context>
chip_gen: v7x
topology: tpu7x:2x2x1
jax: 0.10.0
libtpu: 0.0.40
codegen_flags: <defaults>
</compile_context>

<pallas_src>
import functools

import jax
import jax.numpy as jnp
from jax.experimental import pallas as pl
from jax.experimental.pallas import tpu as pltpu


# ----------------------------------------------------------------------------
# Kernels (rank-agnostic: block is (L, T) or (1, L, T))
# ----------------------------------------------------------------------------

def _decomp_mxu_kernel(a_ref, x_ref, res_ref, mean_ref, *, inv_k):
    """mean = (k*A @ x) * (1/k): single bf16 MXU pass; A holds exact int weights."""
    xs = x_ref[...]
    L, T = xs.shape[-2], xs.shape[-1]
    x = xs.reshape(L, T).astype(jnp.float32)
    mean = jnp.dot(
        a_ref[...], x.astype(jnp.bfloat16),
        preferred_element_type=jnp.float32,
    ) * inv_k                                              # (L, T) f32
    res_ref[...] = (x - mean).reshape(res_ref.shape).astype(res_ref.dtype)
    mean_ref[...] = mean.reshape(mean_ref.shape).astype(mean_ref.dtype)


def _decomp_shift_kernel(x_ref, res_ref, mean_ref, xpad_ref, *, kernel_size, seq_len):
    """VPU path: replicate-pad into a VMEM scratch ref; one running accumulator."""
    k, L = kernel_size, seq_len
    pad = (k - 1) // 2
    xs = x_ref[...]
    T = xs.shape[-1]
    x = xs.reshape(L, T).astype(jnp.float32)

    # Build the padded series once in VMEM scratch (single extra slab).
    xpad_ref[pl.ds(pad, L), :] = x
    if pad > 0:
        xpad_ref[pl.ds(0, pad), :] = jnp.broadcast_to(x[0:1, :], (pad, T))
        xpad_ref[pl.ds(L + pad, pad), :] = jnp.broadcast_to(x[L - 1:L, :], (pad, T))

    # k taps, static unroll, single live accumulator (no concatenate / no tree
    # of k materialized slabs).
    acc = xpad_ref[pl.ds(0, L), :]
    for j in range(1, k):
        acc = acc + xpad_ref[pl.ds(j, L), :]
    mean = acc * (1.0 / k)

    res_ref[...] = (x - mean).reshape(res_ref.shape).astype(res_ref.dtype)
    mean_ref[...] = mean.reshape(mean_ref.shape).astype(mean_ref.dtype)


# ----------------------------------------------------------------------------
# Planning helpers
# ----------------------------------------------------------------------------

def _build_scaled_avg_matrix(L, kernel_size):
    """(L, L) bf16 matrix holding k*A (exact small integers).

    (k*A) @ x followed by *1/k reproduces replicate-pad AvgPool1d exactly up to
    the bf16 rounding of x (A's entries are exactly representable integers)."""
    pad = (kernel_size - 1) // 2
    i = jnp.arange(L)[:, None]   # output (row) positions
    j = jnp.arange(L)[None, :]   # input  (col) positions
    band = ((j >= i - pad) & (j <= i + pad)).astype(jnp.float32)
    extra_front = jnp.where(j == 0, jnp.maximum(pad - i, 0), 0).astype(jnp.float32)
    extra_back = jnp.where(j == L - 1, jnp.maximum(i - (L - 1 - pad), 0), 0).astype(jnp.float32)
    return (band + extra_front + extra_back).astype(jnp.bfloat16)


def _hw_params():
    """Generation-aware VMEM / dispatch parameters (safe fallbacks)."""
    try:
        vmem = int(pltpu.get_tpu_info().vmem_capacity_bytes)
    except Exception:
        vmem = 64 * 1024 * 1024          # conservative (v7x per-TC VMEM)
    try:
        is_v5 = "v5" in jax.devices()[0].device_kind.lower()
    except Exception:
        is_v5 = False
    vmem_limit = int(vmem * 0.85)        # raise scoped VMEM limit explicitly
    budget = int(vmem * 0.70)            # working-set budget (headroom for compiler)
    max_mxu_len = 1024 if is_v5 else 2048  # dense-A only while it stays memory-bound
    return vmem_limit, budget, max_mxu_len


def _plan(L, lanes, itemsize, kernel_size, force_path):
    """Pick compute path and lane-tile so the pipelined working set fits VMEM."""
    vmem_limit, budget, max_mxu_len = _hw_params()
    pad = (kernel_size - 1) // 2

    a_bytes = 2 * (L * L * 2)                          # bf16 A x 2 pipeline buffers
    per_lane_mxu = L * (6 * itemsize + 16)             # 2x(in+2out) blocks + f32 temps
    per_lane_shift = per_lane_mxu + (L + 2 * pad) * 4  # + replicate-pad scratch

    use_mxu = (L <= max_mxu_len) and (a_bytes + 128 * per_lane_mxu <= budget)
    if force_path == "mxu":
        use_mxu = True
    elif force_path == "shift":
        use_mxu = False

    per_lane = per_lane_mxu if use_mxu else per_lane_shift
    avail = budget - (a_bytes if use_mxu else 0)
    max_lanes = max(avail // per_lane, 128)
    if lanes <= max_lanes:
        tile = lanes                                    # full lane extent (lane-dense)
    else:
        tile = max((max_lanes // 128) * 128, 128)       # multiple of 128
    return use_mxu, int(tile), vmem_limit


# ----------------------------------------------------------------------------
# pallas_call builders
# ----------------------------------------------------------------------------

def _decomp_lanes(x2, kernel_size, force_path):
    """x2: (L, N). Time on sublanes, N = B*C independent series on lanes."""
    L, N = x2.shape
    pad = (kernel_size - 1) // 2
    use_mxu, TN, vmem_limit = _plan(L, N, x2.dtype.itemsize, kernel_size, force_path)

    grid = (pl.cdiv(N, TN),)
    x_spec = pl.BlockSpec((L, TN), lambda n: (0, n))
    out_specs = (pl.BlockSpec((L, TN), lambda n: (0, n)),
                 pl.BlockSpec((L, TN), lambda n: (0, n)))
    out_shape = (jax.ShapeDtypeStruct((L, N), x2.dtype),
                 jax.ShapeDtypeStruct((L, N), x2.dtype))
    cparams = pltpu.CompilerParams(dimension_semantics=("parallel",),
                                   vmem_limit_bytes=vmem_limit)

    if use_mxu:
        a = _build_scaled_avg_matrix(L, kernel_size)
        a_spec = pl.BlockSpec((L, L), lambda n: (0, 0))   # constant block: DMA'd once
        kern = functools.partial(_decomp_mxu_kernel, inv_k=1.0 / kernel_size)
        return pl.pallas_call(
            kern, out_shape=out_shape,
            grid_spec=pltpu.PrefetchScalarGridSpec(
                num_scalar_prefetch=0, grid=grid,
                in_specs=[a_spec, x_spec], out_specs=out_specs),
            compiler_params=cparams,
        )(a, x2)

    kern = functools.partial(_decomp_shift_kernel, kernel_size=kernel_size, seq_len=L)
    return pl.pallas_call(
        kern, out_shape=out_shape,
        grid_spec=pltpu.PrefetchScalarGridSpec(
            num_scalar_prefetch=0, grid=grid,
            in_specs=[x_spec], out_specs=out_specs,
            scratch_shapes=[pltpu.VMEM((L + 2 * pad, TN), jnp.float32)]),
        compiler_params=cparams,
    )(x2)


def _decomp_channels(x, kernel_size, force_path):
    """x: (B, L, C) with C >= 128: halo-free channel tiling, grid over (B, C-tiles)."""
    B, L, C = x.shape
    pad = (kernel_size - 1) // 2
    use_mxu, TC, vmem_limit = _plan(L, C, x.dtype.itemsize, kernel_size, force_path)

    grid = (B, pl.cdiv(C, TC))
    x_spec = pl.BlockSpec((1, L, TC), lambda b, c: (b, 0, c))
    out_specs = (pl.BlockSpec((1, L, TC), lambda b, c: (b, 0, c)),
                 pl.BlockSpec((1, L, TC), lambda b, c: (b, 0, c)))
    out_shape = (jax.ShapeDtypeStruct((B, L, C), x.dtype),
                 jax.ShapeDtypeStruct((B, L, C), x.dtype))
    cparams = pltpu.CompilerParams(dimension_semantics=("parallel", "parallel"),
                                   vmem_limit_bytes=vmem_limit)

    if use_mxu:
        a = _build_scaled_avg_matrix(L, kernel_size)
        a_spec = pl.BlockSpec((L, L), lambda b, c: (0, 0))
        kern = functools.partial(_decomp_mxu_kernel, inv_k=1.0 / kernel_size)
        return pl.pallas_call(
            kern, out_shape=out_shape,
            grid_spec=pltpu.PrefetchScalarGridSpec(
                num_scalar_prefetch=0, grid=grid,
                in_specs=[a_spec, x_spec], out_specs=out_specs),
            compiler_params=cparams,
        )(a, x)

    kern = functools.partial(_decomp_shift_kernel, kernel_size=kernel_size, seq_len=L)
    return pl.pallas_call(
        kern, out_shape=out_shape,
        grid_spec=pltpu.PrefetchScalarGridSpec(
            num_scalar_prefetch=0, grid=grid,
            in_specs=[x_spec], out_specs=out_specs,
            scratch_shapes=[pltpu.VMEM((L + 2 * pad, TC), jnp.float32)]),
        compiler_params=cparams,
    )(x)


def series_decomp(x, kernel_size, force_path=None):
    """x: (B, L, C) -> (res, moving_mean), both (B, L, C)."""
    assert kernel_size >= 1 and kernel_size % 2 == 1, \
        "odd kernel_size keeps output length == L (matches the PyTorch module's use)"
    B, L, C = x.shape
    if C < 128:
        # Lane-dense layout: fold batch into lanes so stores are unmasked and
        # grid steps are few and large; transposes are cheap at these small C.
        x2 = jnp.transpose(x, (1, 0, 2)).reshape(L, B * C)
        res2, mean2 = _decomp_lanes(x2, kernel_size, force_path)
        res = jnp.transpose(res2.reshape(L, B, C), (1, 0, 2))
        mean = jnp.transpose(mean2.reshape(L, B, C), (1, 0, 2))
        return res, mean
    return _decomp_channels(x, kernel_size, force_path)


# ----------------------------------------------------------------------------
# Pure-JAX reference (mirrors the PyTorch forward)
# ----------------------------------------------------------------------------

def _series_decomp_ref(x, kernel_size):
    pad = (kernel_size - 1) // 2
    front = jnp.repeat(x[:, 0:1, :], pad, axis=1)
    end = jnp.repeat(x[:, -1:, :], pad, axis=1)
    xpad = jnp.concatenate([front, x, end], axis=1)
    L = x.shape[1]
    windows = jnp.stack([xpad[:, j:j + L, :] for j in range(kernel_size)], axis=0)
    mean = jnp.mean(windows, axis=0)
    return x - mean, mean


if __name__ == "__main__":
    key = jax.random.PRNGKey(0)
    k_small, k_wide = jax.random.split(key)
    kernel_size = 5

    # ---- small-C config: lane-dense (L, B*C) path, both compute paths -------
    B, L, C = 2, 16, 8
    x = jax.random.normal(k_small, (B, L, C), dtype=jnp.float32)
    r_ref, m_ref = _series_decomp_ref(x, kernel_size)

    res, mean = series_decomp(x, kernel_size)                       # MXU (bf16) path
    jax.block_until_ready((res, mean))
    assert res.shape == (B, L, C) and mean.shape == (B, L, C)
    assert jnp.allclose(mean, m_ref, atol=2e-2, rtol=2e-2)          # bf16 x rounding
    assert jnp.allclose(res, r_ref, atol=2e-2, rtol=2e-2)

    res_s, mean_s = series_decomp(x, kernel_size, force_path="shift")  # f32 VPU path
    jax.block_until_ready((res_s, mean_s))
    assert jnp.allclose(mean_s, m_ref, atol=1e-5, rtol=1e-5)
    assert jnp.allclose(res_s, r_ref, atol=1e-5, rtol=1e-5)

    # ---- wide-C config: channel-tiled (B, L, C) path, both compute paths ----
    B2, L2, C2 = 2, 16, 128
    xw = jax.random.normal(k_wide, (B2, L2, C2), dtype=jnp.float32)
    rw_ref, mw_ref = _series_decomp_ref(xw, kernel_size)

    rw, mw = series_decomp(xw, kernel_size)
    rws, mws = series_decomp(xw, kernel_size, force_path="shift")
    jax.block_until_ready((rw, mw, rws, mws))
    assert jnp.allclose(mw, mw_ref, atol=2e-2, rtol=2e-2)
    assert jnp.allclose(rw, rw_ref, atol=2e-2, rtol=2e-2)
    assert jnp.allclose(mws, mw_ref, atol=1e-5, rtol=1e-5)
    assert jnp.allclose(rws, rw_ref, atol=1e-5, rtol=1e-5)

    print("KERNEL_OK")
</pallas_src>

<mosaic_0001>
module attributes {stable_mosaic.version = 11 : i64} {
  func.func @_decomp_mxu_kernel(%arg0: i32, %arg1: memref<16x16xbf16, #tpu.memory_space<vmem>>, %arg2: memref<16x16xf32, #tpu.memory_space<vmem>>, %arg3: memref<16x16xf32, #tpu.memory_space<vmem>>, %arg4: memref<16x16xf32, #tpu.memory_space<vmem>>) attributes {dimension_semantics = [#tpu.dimension_semantics<parallel>], iteration_bounds = array<i64: 1>, scalar_prefetch = 0 : i64, scratch_operands = 0 : i64, tpu.core_type = #tpu.core_type<tc>, window_params = [{pipeline_mode = #tpu.pipeline_mode<synchronous>, transform_indices = @transform_0, window_bounds = array<i64: 16, 16>}, {transform_indices = @transform_1, window_bounds = array<i64: 16, 16>}, {transform_indices = @transform_2, window_bounds = array<i64: 16, 16>}, {transform_indices = @transform_3, window_bounds = array<i64: 16, 16>}]} {
    %c0 = arith.constant 0 : index
    %c0_0 = arith.constant 0 : index
    %0 = vector.load %arg2[%c0, %c0_0] : memref<16x16xf32, #tpu.memory_space<vmem>>, vector<16x16xf32>
    %c0_1 = arith.constant 0 : index
    %c0_2 = arith.constant 0 : index
    %1 = vector.load %arg1[%c0_1, %c0_2] : memref<16x16xbf16, #tpu.memory_space<vmem>>, vector<16x16xbf16>
    %2 = arith.truncf %0 : vector<16x16xf32> to vector<16x16xbf16>
    %cst = arith.constant dense<0.000000e+00> : vector<16x16xf32>
    %3 = tpu.matmul %1, %2, %cst {dimension_numbers = #tpu.dot_dimension_numbers<[1], [0], [0], [1], [0, 0, 1, 1], [], []>} : vector<16x16xbf16>, vector<16x16xbf16>, vector<16x16xf32> -> vector<16x16xf32>
    %cst_3 = arith.constant 2.000000e-01 : f32
    %4 = vector.broadcast %cst_3 : f32 to vector<16x16xf32>
    %5 = arith.mulf %3, %4 : vector<16x16xf32>
    %6 = arith.subf %0, %5 : vector<16x16xf32>
    %c0_4 = arith.constant 0 : index
    %c0_5 = arith.constant 0 : index
    %7 = vector.load %arg3[%c0_4, %c0_5] : memref<16x16xf32, #tpu.memory_space<vmem>>, vector<16x16xf32>
    tpu.vector_store %arg3[%c0_4, %c0_5], %6 {strides = array<i32>} : memref<16x16xf32, #tpu.memory_space<vmem>>, vector<16x16xf32>,
    %c0_6 = arith.constant 0 : index
    %c0_7 = arith.constant 0 : index
    %8 = vector.load %arg4[%c0_6, %c0_7] : memref<16x16xf32, #tpu.memory_space<vmem>>, vector<16x16xf32>
    tpu.vector_store %arg4[%c0_6, %c0_7], %5 {strides = array<i32>} : memref<16x16xf32, #tpu.memory_space<vmem>>, vector<16x16xf32>,
    return
  }
  func.func @transform_0(%arg0: i32) -> (i32, i32) {
    %c0_i32 = arith.constant 0 : i32
    %c0_i32_0 = arith.constant 0 : i32
    %c0_i32_1 = arith.constant 0 : i32
    return %c0_i32, %c0_i32_0 : i32, i32
  }
  func.func @transform_1(%arg0: i32) -> (i32, i32) {
    %c0_i32 = arith.constant 0 : i32
    %c0_i32_0 = arith.constant 0 : i32
    return %c0_i32, %arg0 : i32, i32
  }
  func.func @transform_2(%arg0: i32) -> (i32, i32) {
    %c0_i32 = arith.constant 0 : i32
    %c0_i32_0 = arith.constant 0 : i32
    return %c0_i32, %arg0 : i32, i32
  }
  func.func @transform_3(%arg0: i32) -> (i32, i32) {
    %c0_i32 = arith.constant 0 : i32
    %c0_i32_0 = arith.constant 0 : i32
    return %c0_i32, %arg0 : i32, i32
  }
}

</mosaic_0001>

<bundles_post_ra>
// kernel: tpu_custom_call.1
= control target key start
LH: loop header
LB: loop body
LE: loop exit
PB: predicated region body
PF: predicated region fallthrough
CT: control target
= control target key end

     0   :  { %9 = vsyncpa [#allocation3], 0  ;;  %s357_s0 = inlined_call_operand.hbm [shape: bf16[16,16], index: 0, kind: input, shape index: {}]   ;;  %s358_s1 = inlined_call_operand.hbm [shape: f32[16,16], index: 1, kind: input, shape index: {}]   ;;  %s359_s2 = inlined_call_operand.hbm [shape: f32[16,16], index: 2, kind: output, shape index: {0}]   ;;  %s360_s3 = inlined_call_operand.hbm [shape: f32[16,16], index: 3, kind: output, shape index: {1}]  }
   0x1   :  { %10 = vsyncpa [#allocation6], 0 }
   0x2   :  { %11 = vsyncpa [#allocation4], 0 }
   0x3   :  { %12 = vsyncpa [#allocation9], 0  ;;  %s258_s12 = smov [#allocation2]   ;;  %s162_s16 = scalar_lea.hbm %s357_s0, 128 }
   0x4   :  { %s18_s13 = sshll.u32 %s258_s12, 4  ;;  %p163_p0 = scmp.ne.s32.totalorder %s357_s0, %s162_s16  ;;  %s19_s13 = int_to_ptr.vmem [resolvable:$true] %s18_s13 }
   0x5   :  { %p166_p1 = scmp.lt.u32.totalorder %s162_s16, %s357_s0 }
   0x7   :  { %p168_p2 = pnand %p166_p1, %p163_p0 }
   0x9   :  { %171 = shalt.err (!%p168_p2)
}
   0xa   :  { %s172_s21 = scalar_lea.vmem %s19_s13, 128  ;;  %p177_p4 = scmp.lt.s32.totalorder %s19_s13, %s19_s13 }
   0xb   :  { %p173_p3 = scmp.ne.s32.totalorder %s19_s13, %s172_s21  ;;  %p178_p5 = scmp.lt.s32.totalorder %s172_s21, %s172_s21 }
   0xd   :  { %p179_p6 = por %p178_p5, %p177_p4 }
   0xf   :  { %p180_p7 = pnand %p179_p6, %p173_p3 }
  0x11   :  { %183 = shalt.err (!%p180_p7)
}
  0x12   :  { %s259_s22 = smov 64   ;;  %s260_s23 = smov 4  }
  0x13   :  { %24 = dma.hbm_to_vmem [thread:$0]  %s357_s0, 128, %s19_s13, [#allocation3], %s259_s22, %s259_s22, %s260_s23  }
  0x14   :  { %s261_s26 = smov [#allocation5]   ;;  %s184_s30 = scalar_lea.hbm %s358_s1, 256 }
  0x15   :  { %s30_s27 = sshll.u32 %s261_s26, 4  ;;  %p185_p8 = scmp.ne.s32.totalorder %s358_s1, %s184_s30  ;;  %s31_s27 = int_to_ptr.vmem [resolvable:$true] %s30_s27 }
  0x16   :  { %p188_p9 = scmp.lt.u32.totalorder %s184_s30, %s358_s1 }
  0x18   :  { %p190_p10 = pnand %p188_p9, %p185_p8 }
  0x1a   :  { %193 = shalt.err (!%p190_p10)
}
  0x1b   :  { %s194_s8 = scalar_lea.vmem %s31_s27, 256  ;;  %p199_p12 = scmp.lt.s32.totalorder %s31_s27, %s31_s27 }
  0x1c   :  { %p195_p11 = scmp.ne.s32.totalorder %s31_s27, %s194_s8  ;;  %p200_p13 = scmp.lt.s32.totalorder %s194_s8, %s194_s8 }
  0x1e   :  { %p201_p0 = por %p200_p13, %p199_p12 }
  0x20   :  { %p202_p1 = pnand %p201_p0, %p195_p11 }
  0x22   :  { %205 = shalt.err (!%p202_p1)
}
  0x23   :  { %s262_s0 = smov 128   ;;  %s263_s9 = smov 8  }
  0x24   :  { %36 = dma.hbm_to_vmem [thread:$0]  %s358_s1, 256, %s31_s27, [#allocation6], %s262_s0, %s262_s0, %s263_s9  }
  0x25   :  { %250 = dma.done.wait [#allocation3], 128  }
  0x26   :  { %251 = vsyncadd [#allocation3], 4294967168 }
  0x27   :  { %252 = dma.done.wait [#allocation6], 256  }
  0x28   :  { %253 = vsyncadd [#allocation6], 4294967040  ;;  %v264_v0 = vmov 0.0   ;;  %vm265_vm0 = vmmov 0   ;;  %v44_v1 = vld [vmem:[#allocation5] sm:$0xff]  ;;  %v45_v2 = vld [vmem:[#allocation5 + $0x8] sm:$0xff] }
  0x29   :  { %145 = vmatprep.subr.bf16.mxu0 %v264_v0  ;;  %147 = vmatprep.mubr.msk.bf16.mxu0 %vm265_vm0, %v264_v0  ;;  %v48_v3 = vpack.c.bf16 %v45_v2, %v44_v1  ;;  %v161_v4 = vld [vmem:[#allocation2] sm:$0xff]   ;;  %vm54_vm1 = vcmask 130048   ;;  %s266_s12 = smov [#allocation8]   ;;  %s267_s1 = smov [#allocation7]  }
  0x2a   :  { %s124_s13 = sshll.u32 %s266_s12, 4  ;;  %s112_s14 = sshll.u32 %s267_s1, 4  ;;  %s125_s13 = int_to_ptr.vmem [resolvable:$true] %s124_s13  ;;  %s319_s14 = int_to_ptr.vmem [resolvable:$true] %s112_s14 }
  0x2b   :  { %146 = vmatpush3.bf16.msra.mxu0 %v48_v3  ;;  %s206_s15 = scalar_lea.vmem %s125_s13, 256  ;;  %p211_p3 = scmp.lt.s32.totalorder %s125_s13, %s125_s13 }
  0x2c   :  { %p207_p2 = scmp.ne.s32.totalorder %s125_s13, %s206_s15  ;;  %p212_p4 = scmp.lt.s32.totalorder %s206_s15, %s206_s15 }
  0x2e   :  { %148 = vmatmul.mubr.msk.bf16.vlgmr.msra.gmra.mrb[0].mxu0 %vm54_vm1, %v161_v4  ;;  %p213_p5 = por %p212_p4, %p211_p3 }
  0x30   :  { %p214_p6 = pnand %p213_p5, %p207_p2 }
 0x101   :  { %v92_v5 = vpop.f32.mrb[0].mxu0 }
 0x102   :  { %v99_v6 = vmul.f32 0.2, %v92_v5  ;;  %v149_v7 = vpop.f32.mrb[1].mxu0 }
 0x103   :  { %v95_v8 = vpop.f32.mrb[2].mxu0 }
 0x104   :  { %v101_v9 = vsub.f32 %v44_v1, %v99_v6  ;;  %105 = vst.msk [vmem:[#allocation8] sm:$0xff] %vm54_vm1, %v99_v6  ;;  %v100_v10 = vmul.f32 0.2, %v95_v8  ;;  %v150_v11 = vpop.f32.mrb[3].mxu0 }
 0x106   :  { %103 = vst.msk [vmem:[#allocation7] sm:$0xff] %vm54_vm1, %v101_v9  ;;  %v102_v12 = vsub.f32 %v45_v2, %v100_v10  ;;  %106 = vst.msk [vmem:[#allocation8 + $0x8] sm:$0xff] %vm54_vm1, %v100_v10 }
 0x107   :  { %217 = shalt.err (!%p214_p6)
}
 0x108   :  { %s218_s18 = scalar_lea.hbm %s360_s3, 256 }
 0x109   :  { %p219_p7 = scmp.ne.s32.totalorder %s360_s3, %s218_s18  ;;  %p222_p8 = scmp.lt.u32.totalorder %s218_s18, %s360_s3 }
 0x10b   :  { %p224_p9 = pnand %p222_p8, %p219_p7 }
 0x10d   :  { %227 = shalt.err (!%p224_p9)
}
 0x10e   :  { %130 = dma.vmem_to_hbm [thread:$0]  %s125_s13, 256, %s360_s3, [#allocation9], %s262_s0, %s262_s0, %s263_s9   ;;  %104 = vst.msk [vmem:[#allocation7 + $0x8] sm:$0xff] %vm54_vm1, %v102_v12 }
 0x10f   :  { %s228_s25 = scalar_lea.vmem %s319_s14, 256  ;;  %p233_p11 = scmp.lt.s32.totalorder %s319_s14, %s319_s14 }
 0x110   :  { %p229_p10 = scmp.ne.s32.totalorder %s319_s14, %s228_s25  ;;  %p234_p12 = scmp.lt.s32.totalorder %s228_s25, %s228_s25 }
 0x112   :  { %p235_p13 = por %p234_p12, %p233_p11 }
 0x114   :  { %p236_p0 = pnand %p235_p13, %p229_p10 }
 0x116   :  { %239 = shalt.err (!%p236_p0)
}
 0x117   :  { %s240_s28 = scalar_lea.hbm %s359_s2, 256 }
 0x118   :  { %p241_p1 = scmp.ne.s32.totalorder %s359_s2, %s240_s28  ;;  %p244_p2 = scmp.lt.u32.totalorder %s240_s28, %s359_s2 }
 0x11a   :  { %p246_p3 = pnand %p244_p2, %p241_p1 }
 0x11c   :  { %249 = shalt.err (!%p246_p3)
}
 0x11d   :  { %118 = dma.vmem_to_hbm [thread:$0]  %s319_s14, 256, %s359_s2, [#allocation4], %s262_s0, %s262_s0, %s263_s9  }
 0x11e   :  { %254 = dma.done.wait [#allocation4], 256  }
 0x11f   :  { %255 = vsyncadd [#allocation4], 4294967040 }
 0x120   :  { %256 = dma.done.wait [#allocation9], 256  }
 0x121   :  { %257 = vsyncadd [#allocation9], 4294967040 }
 0x122   :  { %137 = vsyncpa [#allocation3], 1 }
 0x123   :  { %138 = vsyncpa [#allocation6], 1 }
 0x124   :  { %139 = vsyncpa [#allocation4], 1 }
 0x125   :  { %140 = vsyncpa [#allocation9], 1 }

</bundles_post_ra>
